<compile_context>
chip_gen: v7x
topology: tpu7x:2x2x1
jax: 0.10.0
libtpu: 0.0.40
codegen_flags: <defaults>
</compile_context>

<pallas_src>
import functools

import jax
import jax.numpy as jnp
from jax.experimental import pallas as pl
from jax.experimental.pallas import tpu as pltpu


LANE = 128
SUBLANE = 8


def _round_up(x, m):
    return ((x + m - 1) // m) * m


def _default_epilogue_dtype():
    """bf16 bias/activation epilogue on v6e/v7x (bf16 VPU/EUP); f32 otherwise."""
    try:
        kind = jax.devices()[0].device_kind.lower()
    except Exception:
        return jnp.float32
    if "v6" in kind or "v7" in kind:
        return jnp.bfloat16
    return jnp.float32


def _apply_activation(h, activation):
    if activation == "tanh":
        return jnp.tanh(h)
    elif activation == "relu":
        return jnp.maximum(h, 0.0)
    elif activation == "sigmoid":
        return jax.nn.sigmoid(h)
    elif activation == "leaky_relu":
        return jnp.where(h > 0, h, 0.01 * h)
    elif activation == "elu":
        return jnp.where(h > 0, h, jnp.exp(h) - 1.0)
    elif activation == "selu":
        scale = 1.0507009873554805
        alpha = 1.6732632423543772
        return scale * jnp.where(h > 0, h, alpha * (jnp.exp(h) - 1.0))
    else:
        raise ValueError(f"Unsupported activation: {activation}")


def mlp_kernel(x_ref, w_ref, b_ref, o_ref, h_scr, *, num_layers, input_dim,
               output_dim, activation, epilogue_dtype):
    """Full MLP on one batch tile (all tensors VMEM-resident).

    x_ref: (TB, input_dim)  f32, natural (narrow) input layout
    w_ref: (L, H, H)        bf16, zero-padded weight stack (h @ W layout)
    b_ref: (L, 1, H)        f32, zero-padded bias stack
    o_ref: (TB, output_dim) f32, narrow output block (masked stores)
    h_scr: (TB, H)          f32 VMEM scratch used to zero-extend x to H lanes
    """
    # Zero-extend input features to the padded 128-lane width in VMEM.
    h_scr[...] = jnp.zeros_like(h_scr)
    h_scr[:, :input_dim] = x_ref[...].astype(jnp.float32)
    h = h_scr[...]

    # L is small (hidden_depth + 1); static unroll is fine here.
    # TODO(synk): switch to lax.fori_loop(..., unroll=True) if hidden_depth > ~8.
    for l in range(num_layers):
        # bf16 MXU operands, f32 accumulation.
        acc = jnp.dot(h.astype(jnp.bfloat16), w_ref[l],
                      preferred_element_type=jnp.float32)
        if l < num_layers - 1:
            # Bias add + activation in the epilogue dtype (bf16 on v6e/v7x).
            h = _apply_activation(
                acc.astype(epilogue_dtype) + b_ref[l].astype(epilogue_dtype),
                activation)
        else:
            # Final layer: keep the output-path bias add in f32.
            h = acc + b_ref[l]

    # Narrow (lane-masked) store: only output_dim lanes of HBM are written.
    o_ref[...] = h[:, :output_dim].astype(o_ref.dtype)


def make_params(key, input_dim, output_dim, hidden_dim, hidden_depth,
                hidden_pad=LANE):
    """nn.Linear-style init (uniform +-1/sqrt(fan_in)), zero-padded to
    (L, H, H) bf16 weights and (L, 1, H) f32 biases, H = hidden_pad >= 128."""
    H = max(hidden_pad, _round_up(max(hidden_dim, input_dim, output_dim), LANE))
    dims = [input_dim] + [hidden_dim] * hidden_depth + [output_dim]
    L = len(dims) - 1  # hidden_depth + 1 linear layers
    w_stack = jnp.zeros((L, H, H), jnp.float32)
    b_stack = jnp.zeros((L, 1, H), jnp.float32)
    keys = jax.random.split(key, 2 * L)
    for l in range(L):
        fan_in, fan_out = dims[l], dims[l + 1]
        bound = 1.0 / jnp.sqrt(jnp.float32(fan_in))
        w = jax.random.uniform(keys[2 * l], (fan_in, fan_out), jnp.float32,
                               minval=-bound, maxval=bound)
        b = jax.random.uniform(keys[2 * l + 1], (fan_out,), jnp.float32,
                               minval=-bound, maxval=bound)
        w_stack = w_stack.at[l, :fan_in, :fan_out].set(w)
        b_stack = b_stack.at[l, 0, :fan_out].set(b)
    return w_stack.astype(jnp.bfloat16), b_stack, L, H


def nn_model_forward(x, w_stack, b_stack, *, input_dim, output_dim,
                     activation="tanh", batch_tile=2048, epilogue_dtype=None):
    if epilogue_dtype is None:
        epilogue_dtype = _default_epilogue_dtype()

    B = x.shape[0]
    L, H, _ = w_stack.shape

    # Batch tile: large (grid-step overhead dominated at small tiles), multiple
    # of 8 sublanes, but capped so the grid keeps >= 2 steps when the batch is
    # big enough (v7x: both TensorCores via the "parallel" batch axis).
    B8 = _round_up(max(B, 1), SUBLANE)
    if B8 > SUBLANE:
        half = _round_up(pl.cdiv(B8, 2), SUBLANE)
        TB = min(batch_tile, max(half, SUBLANE))
    else:
        TB = B8
    TB = _round_up(TB, SUBLANE)
    B_pad = _round_up(B, TB)

    # Only a minimal batch-row pad on the natural narrow (B, input_dim) layout
    # (no 128-lane host-side pad slab, no wide post-kernel slice).
    x_in = x if B_pad == B else jnp.pad(x, ((0, B_pad - B), (0, 0)))

    kernel = functools.partial(
        mlp_kernel, num_layers=L, input_dim=input_dim, output_dim=output_dim,
        activation=activation, epilogue_dtype=epilogue_dtype)

    out = pl.pallas_call(
        kernel,
        out_shape=jax.ShapeDtypeStruct((B_pad, output_dim), jnp.float32),
        grid=(B_pad // TB,),
        in_specs=[
            pl.BlockSpec((TB, input_dim), lambda i: (i, 0)),  # x: batch-tiled
            pl.BlockSpec((L, H, H), lambda i: (0, 0, 0)),     # weights: resident
            pl.BlockSpec((L, 1, H), lambda i: (0, 0, 0)),     # biases: resident
        ],
        out_specs=pl.BlockSpec((TB, output_dim), lambda i: (i, 0)),
        scratch_shapes=[pltpu.VMEM((TB, H), jnp.float32)],
        compiler_params=pltpu.CompilerParams(
            dimension_semantics=("parallel",)),                # 2 TCs on v7x
    )(x_in, w_stack, b_stack)

    return out if B_pad == B else out[:B]


def reference_forward(x, w_stack, b_stack, *, input_dim, output_dim,
                      activation="tanh", epilogue_dtype=jnp.float32):
    """Pure-JAX reference mirroring the kernel's dtype path exactly."""
    B = x.shape[0]
    L, H, _ = w_stack.shape
    h = jnp.zeros((B, H), jnp.float32).at[:, :input_dim].set(
        x.astype(jnp.float32))
    for l in range(L):
        acc = jnp.dot(h.astype(jnp.bfloat16), w_stack[l],
                      preferred_element_type=jnp.float32)
        if l < L - 1:
            h = _apply_activation(
                acc.astype(epilogue_dtype) + b_stack[l].astype(epilogue_dtype),
                activation)
        else:
            h = acc + b_stack[l]
    return h[:, :output_dim]


if __name__ == "__main__":
    # Small, PINN-like shapes: batch of collocation points with a few coords.
    input_dim = 4
    output_dim = 2
    hidden_dim = 32
    hidden_depth = 4          # -> 5 linear layers, tanh between them
    activation = "tanh"

    key = jax.random.PRNGKey(0)
    kx1, kx2, kp = jax.random.split(key, 3)

    w_stack, b_stack, _, _ = make_params(kp, input_dim, output_dim,
                                         hidden_dim, hidden_depth)
    edt = _default_epilogue_dtype()

    # Two cases: tiny batch (grid=1, no padding) and a non-multiple-of-8 batch
    # that exercises the multi-step grid + minimal batch padding/slicing.
    for batch, kx in ((8, kx1), (300, kx2)):
        x = jax.random.normal(kx, (batch, input_dim), jnp.float32)

        out = nn_model_forward(x, w_stack, b_stack,
                               input_dim=input_dim, output_dim=output_dim,
                               activation=activation, epilogue_dtype=edt)
        out = jax.block_until_ready(out)

        ref = reference_forward(x, w_stack, b_stack,
                                input_dim=input_dim, output_dim=output_dim,
                                activation=activation, epilogue_dtype=edt)

        assert out.shape == (batch, output_dim)
        assert jnp.allclose(out, ref, atol=2e-3, rtol=2e-2), (
            f"batch={batch}: max abs err = {jnp.max(jnp.abs(out - ref))}")

    print("KERNEL_OK")
</pallas_src>

<mosaic_0001>
module attributes {stable_mosaic.version = 11 : i64} {
  func.func @mlp_kernel(%arg0: i32, %arg1: memref<8x4xf32, #tpu.memory_space<vmem>>, %arg2: memref<5x128x128xbf16, #tpu.memory_space<vmem>>, %arg3: memref<5x1x128xf32, #tpu.memory_space<vmem>>, %arg4: memref<8x2xf32, #tpu.memory_space<vmem>>, %arg5: memref<8x128xf32, #tpu.memory_space<vmem>>) attributes {dimension_semantics = [#tpu.dimension_semantics<parallel>], iteration_bounds = array<i64: 1>, scalar_prefetch = 0 : i64, scratch_operands = 1 : i64, tpu.core_type = #tpu.core_type<tc>, window_params = [{transform_indices = @transform_0, window_bounds = array<i64: 8, 4>}, {pipeline_mode = #tpu.pipeline_mode<synchronous>, transform_indices = @transform_1, window_bounds = array<i64: 5, 128, 128>}, {pipeline_mode = #tpu.pipeline_mode<synchronous>, transform_indices = @transform_2, window_bounds = array<i64: 5, 1, 128>}, {transform_indices = @transform_3, window_bounds = array<i64: 8, 2>}]} {
    %cst = arith.constant 0.000000e+00 : f32
    %0 = vector.broadcast %cst : f32 to vector<8x128xf32>
    %c0 = arith.constant 0 : index
    %c0_0 = arith.constant 0 : index
    %1 = vector.load %arg5[%c0, %c0_0] : memref<8x128xf32, #tpu.memory_space<vmem>>, vector<8x128xf32>
    tpu.vector_store %arg5[%c0, %c0_0], %0 {strides = array<i32>} : memref<8x128xf32, #tpu.memory_space<vmem>>, vector<8x128xf32>,
    %c0_1 = arith.constant 0 : index
    %c0_2 = arith.constant 0 : index
    %2 = vector.load %arg1[%c0_1, %c0_2] : memref<8x4xf32, #tpu.memory_space<vmem>>, vector<8x4xf32>
    %c0_3 = arith.constant 0 : index
    %c0_4 = arith.constant 0 : index
    %3 = vector.load %arg5[%c0_3, %c0_4] : memref<8x128xf32, #tpu.memory_space<vmem>>, vector<8x4xf32>
    tpu.vector_store %arg5[%c0_3, %c0_4], %2 {strides = array<i32>} : memref<8x128xf32, #tpu.memory_space<vmem>>, vector<8x4xf32>,
    %c0_5 = arith.constant 0 : index
    %c0_6 = arith.constant 0 : index
    %4 = vector.load %arg5[%c0_5, %c0_6] : memref<8x128xf32, #tpu.memory_space<vmem>>, vector<8x128xf32>
    %5 = arith.truncf %4 : vector<8x128xf32> to vector<8x128xbf16>
    %c0_7 = arith.constant 0 : index
    %c0_8 = arith.constant 0 : index
    %c0_9 = arith.constant 0 : index
    %6 = vector.load %arg2[%c0_7, %c0_8, %c0_9] : memref<5x128x128xbf16, #tpu.memory_space<vmem>>, vector<1x128x128xbf16>
    %7 = vector.shape_cast %6 : vector<1x128x128xbf16> to vector<128x128xbf16>
    %cst_10 = arith.constant dense<0.000000e+00> : vector<8x128xf32>
    %8 = tpu.matmul %5, %7, %cst_10 {dimension_numbers = #tpu.dot_dimension_numbers<[1], [0], [0], [1], [0, 0, 1, 1], [], []>} : vector<8x128xbf16>, vector<128x128xbf16>, vector<8x128xf32> -> vector<8x128xf32>
    %c0_11 = arith.constant 0 : index
    %c0_12 = arith.constant 0 : index
    %c0_13 = arith.constant 0 : index
    %9 = vector.load %arg3[%c0_11, %c0_12, %c0_13] : memref<5x1x128xf32, #tpu.memory_space<vmem>>, vector<1x1x128xf32>
    %10 = vector.shape_cast %9 : vector<1x1x128xf32> to vector<1x128xf32>
    %11 = vector.broadcast %10 : vector<1x128xf32> to vector<8x128xf32>
    %12 = arith.addf %8, %11 : vector<8x128xf32>
    %13 = math.tanh %12 : vector<8x128xf32>
    %14 = arith.truncf %13 : vector<8x128xf32> to vector<8x128xbf16>
    %c1 = arith.constant 1 : index
    %c0_14 = arith.constant 0 : index
    %c0_15 = arith.constant 0 : index
    %15 = vector.load %arg2[%c1, %c0_14, %c0_15] : memref<5x128x128xbf16, #tpu.memory_space<vmem>>, vector<1x128x128xbf16>
    %16 = vector.shape_cast %15 : vector<1x128x128xbf16> to vector<128x128xbf16>
    %cst_16 = arith.constant dense<0.000000e+00> : vector<8x128xf32>
    %17 = tpu.matmul %14, %16, %cst_16 {dimension_numbers = #tpu.dot_dimension_numbers<[1], [0], [0], [1], [0, 0, 1, 1], [], []>} : vector<8x128xbf16>, vector<128x128xbf16>, vector<8x128xf32> -> vector<8x128xf32>
    %c1_17 = arith.constant 1 : index
    %c0_18 = arith.constant 0 : index
    %c0_19 = arith.constant 0 : index
    %18 = vector.load %arg3[%c1_17, %c0_18, %c0_19] : memref<5x1x128xf32, #tpu.memory_space<vmem>>, vector<1x1x128xf32>
    %19 = vector.shape_cast %18 : vector<1x1x128xf32> to vector<1x128xf32>
    %20 = vector.broadcast %19 : vector<1x128xf32> to vector<8x128xf32>
    %21 = arith.addf %17, %20 : vector<8x128xf32>
    %22 = math.tanh %21 : vector<8x128xf32>
    %23 = arith.truncf %22 : vector<8x128xf32> to vector<8x128xbf16>
    %c2 = arith.constant 2 : index
    %c0_20 = arith.constant 0 : index
    %c0_21 = arith.constant 0 : index
    %24 = vector.load %arg2[%c2, %c0_20, %c0_21] : memref<5x128x128xbf16, #tpu.memory_space<vmem>>, vector<1x128x128xbf16>
    %25 = vector.shape_cast %24 : vector<1x128x128xbf16> to vector<128x128xbf16>
    %cst_22 = arith.constant dense<0.000000e+00> : vector<8x128xf32>
    %26 = tpu.matmul %23, %25, %cst_22 {dimension_numbers = #tpu.dot_dimension_numbers<[1], [0], [0], [1], [0, 0, 1, 1], [], []>} : vector<8x128xbf16>, vector<128x128xbf16>, vector<8x128xf32> -> vector<8x128xf32>
    %c2_23 = arith.constant 2 : index
    %c0_24 = arith.constant 0 : index
    %c0_25 = arith.constant 0 : index
    %27 = vector.load %arg3[%c2_23, %c0_24, %c0_25] : memref<5x1x128xf32, #tpu.memory_space<vmem>>, vector<1x1x128xf32>
    %28 = vector.shape_cast %27 : vector<1x1x128xf32> to vector<1x128xf32>
    %29 = vector.broadcast %28 : vector<1x128xf32> to vector<8x128xf32>
    %30 = arith.addf %26, %29 : vector<8x128xf32>
    %31 = math.tanh %30 : vector<8x128xf32>
    %32 = arith.truncf %31 : vector<8x128xf32> to vector<8x128xbf16>
    %c3 = arith.constant 3 : index
    %c0_26 = arith.constant 0 : index
    %c0_27 = arith.constant 0 : index
    %33 = vector.load %arg2[%c3, %c0_26, %c0_27] : memref<5x128x128xbf16, #tpu.memory_space<vmem>>, vector<1x128x128xbf16>
    %34 = vector.shape_cast %33 : vector<1x128x128xbf16> to vector<128x128xbf16>
    %cst_28 = arith.constant dense<0.000000e+00> : vector<8x128xf32>
    %35 = tpu.matmul %32, %34, %cst_28 {dimension_numbers = #tpu.dot_dimension_numbers<[1], [0], [0], [1], [0, 0, 1, 1], [], []>} : vector<8x128xbf16>, vector<128x128xbf16>, vector<8x128xf32> -> vector<8x128xf32>
    %c3_29 = arith.constant 3 : index
    %c0_30 = arith.constant 0 : index
    %c0_31 = arith.constant 0 : index
    %36 = vector.load %arg3[%c3_29, %c0_30, %c0_31] : memref<5x1x128xf32, #tpu.memory_space<vmem>>, vector<1x1x128xf32>
    %37 = vector.shape_cast %36 : vector<1x1x128xf32> to vector<1x128xf32>
    %38 = vector.broadcast %37 : vector<1x128xf32> to vector<8x128xf32>
    %39 = arith.addf %35, %38 : vector<8x128xf32>
    %40 = math.tanh %39 : vector<8x128xf32>
    %41 = arith.truncf %40 : vector<8x128xf32> to vector<8x128xbf16>
    %c4 = arith.constant 4 : index
    %c0_32 = arith.constant 0 : index
    %c0_33 = arith.constant 0 : index
    %42 = vector.load %arg2[%c4, %c0_32, %c0_33] : memref<5x128x128xbf16, #tpu.memory_space<vmem>>, vector<1x128x128xbf16>
    %43 = vector.shape_cast %42 : vector<1x128x128xbf16> to vector<128x128xbf16>
    %cst_34 = arith.constant dense<0.000000e+00> : vector<8x128xf32>
    %44 = tpu.matmul %41, %43, %cst_34 {dimension_numbers = #tpu.dot_dimension_numbers<[1], [0], [0], [1], [0, 0, 1, 1], [], []>} : vector<8x128xbf16>, vector<128x128xbf16>, vector<8x128xf32> -> vector<8x128xf32>
    %c4_35 = arith.constant 4 : index
    %c0_36 = arith.constant 0 : index
    %c0_37 = arith.constant 0 : index
    %45 = vector.load %arg3[%c4_35, %c0_36, %c0_37] : memref<5x1x128xf32, #tpu.memory_space<vmem>>, vector<1x1x128xf32>
    %46 = vector.shape_cast %45 : vector<1x1x128xf32> to vector<1x128xf32>
    %47 = vector.broadcast %46 : vector<1x128xf32> to vector<8x128xf32>
    %48 = arith.addf %44, %47 : vector<8x128xf32>
    %49 = vector.extract_strided_slice %48 {offsets = [0, 0], sizes = [8, 2], strides = [1, 1]} : vector<8x128xf32> to vector<8x2xf32>
    %c0_38 = arith.constant 0 : index
    %c0_39 = arith.constant 0 : index
    %50 = vector.load %arg4[%c0_38, %c0_39] : memref<8x2xf32, #tpu.memory_space<vmem>>, vector<8x2xf32>
    tpu.vector_store %arg4[%c0_38, %c0_39], %49 {strides = array<i32>} : memref<8x2xf32, #tpu.memory_space<vmem>>, vector<8x2xf32>,
    return
  }
  func.func @transform_0(%arg0: i32) -> (i32, i32) {
    %c0_i32 = arith.constant 0 : i32
    %c0_i32_0 = arith.constant 0 : i32
    return %arg0, %c0_i32 : i32, i32
  }
  func.func @transform_1(%arg0: i32) -> (i32, i32, i32) {
    %c0_i32 = arith.constant 0 : i32
    %c0_i32_0 = arith.constant 0 : i32
    %c0_i32_1 = arith.constant 0 : i32
    %c0_i32_2 = arith.constant 0 : i32
    return %c0_i32, %c0_i32_0, %c0_i32_1 : i32, i32, i32
  }
  func.func @transform_2(%arg0: i32) -> (i32, i32, i32) {
    %c0_i32 = arith.constant 0 : i32
    %c0_i32_0 = arith.constant 0 : i32
    %c0_i32_1 = arith.constant 0 : i32
    %c0_i32_2 = arith.constant 0 : i32
    return %c0_i32, %c0_i32_0, %c0_i32_1 : i32, i32, i32
  }
  func.func @transform_3(%arg0: i32) -> (i32, i32) {
    %c0_i32 = arith.constant 0 : i32
    %c0_i32_0 = arith.constant 0 : i32
    return %arg0, %c0_i32 : i32, i32
  }
}

</mosaic_0001>

<bundles_post_ra>
// kernel: tpu_custom_call.1
= control target key start
LH: loop header
LB: loop body
LE: loop exit
PB: predicated region body
PF: predicated region fallthrough
CT: control target
= control target key end

     0   :  { %8 = vsyncpa [#allocation4], 0  ;;  %s884_s12 = smov [#allocation3]   ;;  %s993_s0 = inlined_call_operand.vmem [shape: f32[8,4], index: 0, kind: input, shape index: {}]   ;;  %s994_s1 = inlined_call_operand.hbm [shape: bf16[5,128,128], index: 1, kind: input, shape index: {}]   ;;  %s995_s2 = inlined_call_operand.vmem [shape: f32[5,1,128], index: 2, kind: input, shape index: {}]   ;;  %s996_s3 = inlined_call_operand.vmem [shape: f32[8,2], index: 3, kind: output, shape index: {}]  }
   0x1   :  { %s16_s13 = sshll.u32 %s884_s12, 4  ;;  %s860_s16 = scalar_lea.hbm %s994_s1, 5120  ;;  %s17_s13 = int_to_ptr.vmem [resolvable:$true] %s16_s13 }
   0x2   :  { %p861_p0 = scmp.ne.s32.totalorder %s994_s1, %s860_s16  ;;  %p864_p1 = scmp.lt.u32.totalorder %s860_s16, %s994_s1 }
   0x4   :  { %p866_p2 = pnand %p864_p1, %p861_p0 }
   0x6   :  { %869 = shalt.err (!%p866_p2)
}
   0x7   :  { %s870_s21 = scalar_lea.vmem %s17_s13, 5120  ;;  %p875_p4 = scmp.lt.s32.totalorder %s17_s13, %s17_s13 }
   0x8   :  { %p871_p3 = scmp.ne.s32.totalorder %s17_s13, %s870_s21  ;;  %p876_p5 = scmp.lt.s32.totalorder %s870_s21, %s870_s21 }
   0xa   :  { %p877_p6 = por %p876_p5, %p875_p4 }
   0xc   :  { %p878_p7 = pnand %p877_p6, %p871_p3 }
   0xe   :  { %881 = shalt.err (!%p878_p7)
}
   0xf   :  { %s885_s22 = smov 64   ;;  %s886_s23 = smov 4  }
  0x10   :  { %22 = dma.hbm_to_vmem [thread:$0]  %s994_s1, 5120, %s17_s13, [#allocation4], %s885_s22, %s885_s22, %s886_s23  }
  0x11   :  { %882 = dma.done.wait [#allocation4], 5120  }
  0x12   :  { %883 = vsyncadd [#allocation4], 4294962176  ;;  %v887_v0 = vmov 0.0   ;;  %vm888_vm0 = vmmov 0   ;;  %v812_v1 = vld [vmem:[#allocation3] sm:$0xff]   ;;  %v813_v2 = vld [vmem:[#allocation3 + $0x8] sm:$0xff]  }
  0x13   :  { %707 = vmatprep.subr.bf16.mxu0 %v887_v0  ;;  %29 = vst [vmem:[#allocation2] sm:$0xff] %v887_v0  ;;  %723 = vmatprep.mubr.msk.bf16.mxu0 %vm888_vm0, %v887_v0  ;;  %v814_v3 = vld [vmem:[#allocation3 + $0x10] sm:$0xff]   ;;  %vm31_vm1 = vcmask 31744   ;;  %v30_v4 = vld [vmem:[%s993_s0] sm:$0xff]  ;;  %v820_v5 = vld [vmem:[#allocation3 + $0x40] sm:$0xff]   ;;  %vm606_vm2 = vcmask 15360  }
  0x14   :  { %727 = vmatprep.subr.bf16.mxu1 %v887_v0  ;;  %743 = vmatprep.mubr.msk.bf16.mxu1 %vm888_vm0, %v887_v0  ;;  %32 = vst.msk [vmem:[#allocation2] sm:$0xff] %vm31_vm1, %v30_v4  ;;  %v815_v6 = vld [vmem:[#allocation3 + $0x18] sm:$0xff]   ;;  %v821_v7 = vld [vmem:[#allocation3 + $0x48] sm:$0xff]   ;;  %v816_v8 = vld [vmem:[#allocation3 + $0x20] sm:$0xff]  }
  0x15   :  { %708 = vmatpush3.bf16.msra.mxu0 %v812_v1  ;;  %728 = vmatpush3.bf16.msra.mxu1 %v820_v5  ;;  %v822_v9 = vld [vmem:[#allocation3 + $0x50] sm:$0xff]   ;;  %v817_v10 = vld [vmem:[#allocation3 + $0x28] sm:$0xff]   ;;  %v823_v11 = vld [vmem:[#allocation3 + $0x58] sm:$0xff]  }
  0x16   :  { %709 = vmatprep.subr.bf16.mxu0 %v887_v0  ;;  %729 = vmatprep.subr.bf16.mxu1 %v887_v0  ;;  %v818_v12 = vld [vmem:[#allocation3 + $0x30] sm:$0xff]   ;;  %v819_v13 = vld [vmem:[#allocation3 + $0x38] sm:$0xff]   ;;  %v824_v16 = vld [vmem:[#allocation3 + $0x60] sm:$0xff]  }
  0x17   :  { %v825_v17 = vld [vmem:[#allocation3 + $0x68] sm:$0xff]   ;;  %v826_v18 = vld [vmem:[#allocation3 + $0x70] sm:$0xff]   ;;  %v827_v19 = vld [vmem:[#allocation3 + $0x78] sm:$0xff]  }
  0x18   :  { %v828_v20 = vld [vmem:[#allocation3 + $0x80] sm:$0xff]   ;;  %v829_v21 = vld [vmem:[#allocation3 + $0x88] sm:$0xff]   ;;  %v830_v22 = vld [vmem:[#allocation3 + $0x90] sm:$0xff]  }
  0x19   :  { %710 = vmatpush3.bf16.msra.mxu0 %v813_v2  ;;  %730 = vmatpush3.bf16.msra.mxu1 %v821_v7  ;;  %v831_v23 = vld [vmem:[#allocation3 + $0x98] sm:$0xff]   ;;  %v832_v32 = vld [vmem:[#allocation3 + $0xa0] sm:$0xff]   ;;  %v833_v33 = vld [vmem:[#allocation3 + $0xa8] sm:$0xff]  }
  0x1a   :  { %711 = vmatprep.subr.bf16.mxu0 %v887_v0  ;;  %731 = vmatprep.subr.bf16.mxu1 %v887_v0  ;;  %v613_v24 = vld [vmem:[%s995_s2] ss:$0 sm:$0xff]  ;;  %v834_v34 = vld [vmem:[#allocation3 + $0xb0] sm:$0xff]   ;;  %v836_v36 = vld [vmem:[#allocation3 + $0xc0] sm:$0xff]  }
  0x1b   :  { %v33_v14 = vld [vmem:[#allocation2] sm:$0xff]  ;;  %v837_v37 = vld [vmem:[#allocation3 + $0xc8] sm:$0xff]   ;;  %v838_v38 = vld [vmem:[#allocation3 + $0xd0] sm:$0xff]  }
  0x1c   :  { %v34_v15 = vpack.c.bf16 %v33_v14, %v33_v14  ;;  %v835_v35 = vld [vmem:[#allocation3 + $0xb8] sm:$0xff]   ;;  %v840_v48 = vld [vmem:[#allocation3 + $0xe0] sm:$0xff]   ;;  %v841_v49 = vld [vmem:[#allocation3 + $0xe8] sm:$0xff]  }
  0x1d   :  { %712 = vmatpush3.bf16.msra.mxu0 %v814_v3  ;;  %732 = vmatpush3.bf16.msra.mxu1 %v822_v9  ;;  %v839_v39 = vld [vmem:[#allocation3 + $0xd8] sm:$0xff]   ;;  %v842_v50 = vld [vmem:[#allocation3 + $0xf0] sm:$0xff]   ;;  %v844_v52 = vld [vmem:[#allocation3 + $0x100] sm:$0xff]  }
  0x1e   :  { %713 = vmatprep.subr.bf16.mxu0 %v887_v0  ;;  %733 = vmatprep.subr.bf16.mxu1 %v887_v0  ;;  %v623_v40 = vld [vmem:[%s995_s2 + $0x1] ss:$0 sm:$0xff]  ;;  %v845_v53 = vld [vmem:[#allocation3 + $0x108] sm:$0xff]   ;;  %v846_v54 = vld [vmem:[#allocation3 + $0x110] sm:$0xff]  }
  0x1f   :  { %v843_v51 = vld [vmem:[#allocation3 + $0xf8] sm:$0xff]   ;;  %v848_v1 = vld [vmem:[#allocation3 + $0x120] sm:$0xff]   ;;  %v849_v2 = vld [vmem:[#allocation3 + $0x128] sm:$0xff]  }
  0x20   :  { %v847_v55 = vld [vmem:[#allocation3 + $0x118] sm:$0xff]   ;;  %v850_v3 = vld [vmem:[#allocation3 + $0x130] sm:$0xff]  }
  0x21   :  { %714 = vmatpush3.bf16.msra.mxu0 %v815_v6  ;;  %734 = vmatpush3.bf16.msra.mxu1 %v823_v11  ;;  %v633_v56 = vld [vmem:[%s995_s2 + $0x2] ss:$0 sm:$0xff]  ;;  %v643_v5 = vld [vmem:[%s995_s2 + $0x3] ss:$0 sm:$0xff] }
  0x22   :  { %715 = vmatprep.subr.bf16.mxu0 %v887_v0  ;;  %735 = vmatprep.subr.bf16.mxu1 %v887_v0  ;;  %v851_v4 = vld [vmem:[#allocation3 + $0x138] sm:$0xff]  }
  0x25   :  { %716 = vmatpush3.bf16.msra.mxu0 %v816_v8  ;;  %736 = vmatpush3.bf16.msra.mxu1 %v824_v16 }
  0x26   :  { %717 = vmatprep.subr.bf16.mxu0 %v887_v0  ;;  %737 = vmatprep.subr.bf16.mxu1 %v887_v0 }
  0x29   :  { %718 = vmatpush3.bf16.msra.mxu0 %v817_v10  ;;  %738 = vmatpush3.bf16.msra.mxu1 %v825_v17 }
  0x2a   :  { %719 = vmatprep.subr.bf16.mxu0 %v887_v0  ;;  %739 = vmatprep.subr.bf16.mxu1 %v887_v0 }
  0x2d   :  { %720 = vmatpush3.bf16.msra.mxu0 %v818_v12  ;;  %740 = vmatpush3.bf16.msra.mxu1 %v826_v18 }
  0x2e   :  { %721 = vmatprep.subr.bf16.mxu0 %v887_v0  ;;  %741 = vmatprep.subr.bf16.mxu1 %v887_v0 }
  0x31   :  { %722 = vmatpush3.bf16.msra.mxu0 %v819_v13  ;;  %742 = vmatpush3.bf16.msra.mxu1 %v827_v19  ;;  %v653_v13 = vld [vmem:[%s995_s2 + $0x4] ss:$0 sm:$0xff] }
  0x32   :  { %747 = vmatprep.subr.bf16.mxu0 %v887_v0  ;;  %767 = vmatprep.subr.bf16.mxu1 %v887_v0 }
  0x34   :  { %724 = vmatmul.mubr.bf16.vlgmr.msra.gmra.mrb[0].mxu0 %v34_v15 }
  0x35   :  { %763 = vmatprep.mubr.msk.bf16.mxu0 %vm888_vm0, %v887_v0  ;;  %748 = vmatpush3.bf16.msra.mxu0 %v828_v20 }
  0x36   :  { %749 = vmatprep.subr.bf16.mxu0 %v887_v0 }
  0x39   :  { %750 = vmatpush3.bf16.msra.mxu0 %v829_v21 }
  0x3a   :  { %751 = vmatprep.subr.bf16.mxu0 %v887_v0 }
  0x3d   :  { %752 = vmatpush3.bf16.msra.mxu0 %v830_v22 }
  0x3e   :  { %753 = vmatprep.subr.bf16.mxu0 %v887_v0 }
  0x41   :  { %754 = vmatpush3.bf16.msra.mxu0 %v831_v23 }
  0x42   :  { %755 = vmatprep.subr.bf16.mxu0 %v887_v0 }
  0x45   :  { %756 = vmatpush3.bf16.msra.mxu0 %v832_v32 }
  0x46   :  { %757 = vmatprep.subr.bf16.mxu0 %v887_v0 }
  0x49   :  { %758 = vmatpush3.bf16.msra.mxu0 %v833_v33 }
  0x4a   :  { %759 = vmatprep.subr.bf16.mxu0 %v887_v0 }
  0x4d   :  { %760 = vmatpush3.bf16.msra.mxu0 %v834_v34 }
  0x4e   :  { %761 = vmatprep.subr.bf16.mxu0 %v887_v0 }
  0x51   :  { %762 = vmatpush3.bf16.msra.mxu0 %v835_v35 }
  0x52   :  { %787 = vmatprep.subr.bf16.mxu0 %v887_v0 }
 0x107   :  { %v140_v25 = vpop.f32.mrb[0].mxu0 }
 0x108   :  { %v141_v26 = vadd.f32 %v613_v24, %v140_v25  ;;  %v725_v27 = vpop.f32.mrb[1].mxu0 }
 0x109   :  { %v143_v28 = vpop.f32.mrb[2].mxu0 }
 0x10a   :  { %852 = vtanh.f32 %v141_v26  ;;  %v726_v29 = vpop.f32.mrb[3].mxu0 }
 0x114   :  { %v853_v30 = vpop.eup %852 }
 0x115   :  { %v147_v31 = vpack.c.bf16 %v853_v30, %v853_v30 }
 0x117   :  { %744 = vmatmul.mubr.bf16.vlgmr.msra.gmra.mrb[0].mxu1 %v147_v31 }
 0x118   :  { %783 = vmatprep.mubr.msk.bf16.mxu1 %vm888_vm0, %v887_v0  ;;  %768 = vmatpush3.bf16.msra.mxu1 %v836_v36 }
 0x119   :  { %769 = vmatprep.subr.bf16.mxu1 %v887_v0 }
 0x11c   :  { %770 = vmatpush3.bf16.msra.mxu1 %v837_v37 }
 0x11d   :  { %771 = vmatprep.subr.bf16.mxu1 %v887_v0 }
 0x120   :  { %772 = vmatpush3.bf16.msra.mxu1 %v838_v38 }
 0x121   :  { %773 = vmatprep.subr.bf16.mxu1 %v887_v0 }
 0x124   :  { %774 = vmatpush3.bf16.msra.mxu1 %v839_v39 }
 0x125   :  { %775 = vmatprep.subr.bf16.mxu1 %v887_v0 }
 0x128   :  { %776 = vmatpush3.bf16.msra.mxu1 %v840_v48 }
 0x129   :  { %777 = vmatprep.subr.bf16.mxu1 %v887_v0 }
 0x12c   :  { %778 = vmatpush3.bf16.msra.mxu1 %v841_v49 }
 0x12d   :  { %779 = vmatprep.subr.bf16.mxu1 %v887_v0 }
 0x130   :  { %780 = vmatpush3.bf16.msra.mxu1 %v842_v50 }
 0x131   :  { %781 = vmatprep.subr.bf16.mxu1 %v887_v0 }
 0x134   :  { %782 = vmatpush3.bf16.msra.mxu1 %v843_v51 }
 0x1ea   :  { %v255_v41 = vpop.f32.mrb[0].mxu1 }
 0x1eb   :  { %v256_v42 = vadd.f32 %v623_v40, %v255_v41  ;;  %v745_v43 = vpop.f32.mrb[1].mxu1 }
 0x1ec   :  { %v258_v44 = vpop.f32.mrb[2].mxu1 }
 0x1ed   :  { %854 = vtanh.f32 %v256_v42  ;;  %v746_v45 = vpop.f32.mrb[3].mxu1 }
 0x1f7   :  { %v855_v46 = vpop.eup %854 }
 0x1f8   :  { %v262_v47 = vpack.c.bf16 %v855_v46, %v855_v46 }
 0x1fa   :  { %764 = vmatmul.mubr.bf16.vlgmr.msra.gmra.mrb[4].mxu0 %v262_v47 }
 0x1fb   :  { %803 = vmatprep.mubr.msk.bf16.mxu0 %vm888_vm0, %v887_v0  ;;  %788 = vmatpush3.bf16.msra.mxu0 %v844_v52 }
 0x1fc   :  { %789 = vmatprep.subr.bf16.mxu0 %v887_v0 }
 0x1ff   :  { %790 = vmatpush3.bf16.msra.mxu0 %v845_v53 }
 0x200   :  { %791 = vmatprep.subr.bf16.mxu0 %v887_v0 }
 0x203   :  { %792 = vmatpush3.bf16.msra.mxu0 %v846_v54 }
 0x204   :  { %793 = vmatprep.subr.bf16.mxu0 %v887_v0 }
 0x207   :  { %794 = vmatpush3.bf16.msra.mxu0 %v847_v55 }
 0x208   :  { %795 = vmatprep.subr.bf16.mxu0 %v887_v0 }
 0x20b   :  { %796 = vmatpush3.bf16.msra.mxu0 %v848_v1 }
 0x20c   :  { %797 = vmatprep.subr.bf16.mxu0 %v887_v0 }
 0x20f   :  { %798 = vmatpush3.bf16.msra.mxu0 %v849_v2 }
 0x210   :  { %799 = vmatprep.subr.bf16.mxu0 %v887_v0 }
 0x213   :  { %800 = vmatpush3.bf16.msra.mxu0 %v850_v3 }
 0x214   :  { %801 = vmatprep.subr.bf16.mxu0 %v887_v0 }
 0x217   :  { %802 = vmatpush3.bf16.msra.mxu0 %v851_v4 }
 0x2cd   :  { %v370_v57 = vpop.f32.mrb[4].mxu0 }
 0x2ce   :  { %v371_v58 = vadd.f32 %v633_v56, %v370_v57  ;;  %v765_v59 = vpop.f32.mrb[5].mxu0 }
 0x2cf   :  { %v373_v60 = vpop.f32.mrb[6].mxu0 }
 0x2d0   :  { %856 = vtanh.f32 %v371_v58  ;;  %v766_v61 = vpop.f32.mrb[7].mxu0 }
 0x2da   :  { %v857_v62 = vpop.eup %856 }
 0x2db   :  { %v377_v63 = vpack.c.bf16 %v857_v62, %v857_v62 }
 0x2dd   :  { %784 = vmatmul.mubr.bf16.vlgmr.msra.gmra.mrb[4].mxu1 %v377_v63 }
 0x3b0   :  { %v485_v6 = vpop.f32.mrb[4].mxu1 }
 0x3b1   :  { %v486_v7 = vadd.f32 %v643_v5, %v485_v6  ;;  %v785_v8 = vpop.f32.mrb[5].mxu1 }
 0x3b2   :  { %v488_v9 = vpop.f32.mrb[6].mxu1 }
 0x3b3   :  { %858 = vtanh.f32 %v486_v7  ;;  %v786_v10 = vpop.f32.mrb[7].mxu1 }
 0x3bd   :  { %v859_v11 = vpop.eup %858 }
 0x3be   :  { %v492_v12 = vpack.c.bf16 %v859_v11, %v859_v11 }
 0x3c0   :  { %804 = vmatmul.mubr.bf16.vlgmr.msra.gmra.mrb[8].mxu0 %v492_v12 }
 0x493   :  { %v600_v0 = vpop.f32.mrb[8].mxu0 }
 0x494   :  { %v601_v14 = vadd.f32 %v653_v13, %v600_v0  ;;  %v805_v15 = vpop.f32.mrb[9].mxu0 }
 0x495   :  { %v603_v16 = vpop.f32.mrb[10].mxu0 }
 0x496   :  { %607 = vst.msk [vmem:[%s996_s3] sm:$0xff] %vm606_vm2, %v601_v14  ;;  %v806_v17 = vpop.f32.mrb[11].mxu0 }
 0x497   :  { %612 = vsyncpa [#allocation4], 1 }

</bundles_post_ra>
